<compile_context>
chip_gen: v5e
topology: v5e:2x2
jax: 0.10.0
libtpu: 0.0.40
codegen_flags: <defaults>
</compile_context>

<pallas_src>
import math
import jax
import jax.numpy as jnp
from jax.experimental import pallas as pl
from jax.experimental.pallas import tpu as pltpu

D_MODEL = 4
MAX_LEN = 10

_LANE = 128
_SUBLANE = 8
_COL_TILE_CAP = 4096                  # lane-aligned upper bound on the column tile
_ROW_TILE_CAP = 512                   # sublane-aligned upper bound on the row tile
_FALLBACK_VMEM = 64 * 1024 * 1024     # v7x physical VMEM; safe floor if query fails


def make_pe(d_model: int, max_len: int) -> jnp.ndarray:
    """Sinusoidal positional-encoding table, (max_len, d_model), float32."""
    position = jnp.arange(0, max_len, dtype=jnp.float32)[:, None]
    div_term = jnp.exp(
        jnp.arange(0, d_model, 2, dtype=jnp.float32) * (-math.log(10000.0) / d_model)
    )
    angles = position * div_term
    pe = jnp.zeros((max_len, d_model), dtype=jnp.float32)
    pe = pe.at[:, 0::2].set(jnp.sin(angles)[:, : (d_model + 1) // 2])
    pe = pe.at[:, 1::2].set(jnp.cos(angles)[:, : d_model // 2])
    return pe


def _pos_enc_kernel(x_ref, pe_ref, o_ref):
    # x_ref: (tR, tC), pe_ref: (1, tC) or (tR, tC) -> VPU broadcast add.
    o_ref[...] = x_ref[...] + pe_ref[...]


def _round_down(x: int, m: int) -> int:
    return (x // m) * m


def _vmem_limit_bytes() -> int:
    try:
        cap = int(pltpu.get_tpu_info().vmem_capacity_bytes)
    except Exception:
        cap = _FALLBACK_VMEM
    # Half of physical VMEM: 64 MiB on 128-MiB parts (v5e/v6e), 32 MiB on v7x.
    return min(cap // 2, 64 * 1024 * 1024)


def _fold_factor(B: int, S: int, D: int) -> int:
    """Smallest G dividing S so (B*G, (S//G)*D) fills 8 sublanes x 128 lanes."""
    if B % _SUBLANE == 0:
        return 1
    for G in range(2, S + 1):
        if S % G == 0 and (B * G) % _SUBLANE == 0 and ((S // G) * D) % _LANE == 0:
            return G
    return 1


def _choose_tiles(R: int, C: int, G: int, itemsize: int, budget: int):
    """Pick (tR, tC): (8,128)-granule aligned (or full extent), within the VMEM
    budget, and with enough grid steps to keep the DMA pipeline busy."""
    row_step = (_SUBLANE * G) // math.gcd(_SUBLANE, G)   # lcm(8, G)

    tR = max(row_step, _round_down(_ROW_TILE_CAP, row_step))
    if tR >= R:
        tR = R                                           # full extent is always legal
    tC = max(_LANE, _round_down(_COL_TILE_CAP, _LANE))
    if tC >= C:
        tC = C

    def ws(tr, tc):  # per-step working set: x-in + out double-buffered, pe too
        pe_rows = tr if G > 1 else 1
        return (2 * 2 * tr + 2 * pe_rows) * tc * itemsize

    while ws(tR, tC) > budget and tC > _LANE:
        tC = max(_LANE, _round_down(tC // 2, _LANE))
    while ws(tR, tC) > budget and tR > row_step:
        tR = max(row_step, _round_down(tR // 2, row_step))

    # Non-trivial inputs: keep >= ~8 blocks so input DMA of block i+1 overlaps
    # compute of i and writeback of i-1 (a single-block grid fully serializes),
    # and so both v7x TensorCores get pipeline depth on the parallel axes.
    def nblocks(tr, tc):
        return pl.cdiv(R, tr) * pl.cdiv(C, tc)

    if R * C * itemsize > (2 << 20):
        while nblocks(tR, tC) < 8 and tC > 4 * _LANE:
            tC = max(4 * _LANE, _round_down(tC // 2, _LANE))
        while nblocks(tR, tC) < 8 and tR > row_step:
            tR = max(row_step, _round_down(tR // 2, row_step))

    return tR, tC


def positional_encoding(x: jnp.ndarray, pe: jnp.ndarray) -> jnp.ndarray:
    """x: (B, S, D), pe: (max_len, D) -> x + pe[None, :S, :] (PyTorch semantics)."""
    B, S, D = x.shape
    max_len, d_model = pe.shape
    assert S <= max_len, f"sequence length {S} exceeds max_len {max_len}"
    assert D == d_model, "d_model mismatch between x and pe"

    out_dtype = jnp.result_type(x.dtype, pe.dtype)   # PyTorch-style promotion

    # Sublane folding for small batches: (B, S, D) -> (B*G, (S//G)*D).
    G = _fold_factor(B, S, D)
    R, C = B * G, (S // G) * D

    x2 = x.reshape(R, C).astype(out_dtype)

    itemsize = jnp.dtype(out_dtype).itemsize
    vmem_limit = _vmem_limit_bytes()
    tR, tC = _choose_tiles(R, C, G, itemsize, budget=vmem_limit // 2)

    # NOTE: for a fixed (S, dtype) this pe slab is constant; in real use cache
    # it outside the per-call path instead of rebuilding it every call.
    if G > 1:
        pe_fold = pe[:S].reshape(G, C).astype(out_dtype)
        pe2 = jnp.tile(pe_fold, (tR // G, 1))          # (tR, C): rows repeat with period G
        pe_block = (tR, tC)
    else:
        pe2 = pe[:S].reshape(1, C).astype(out_dtype)   # (1, C): broadcast over sublanes
        pe_block = (1, tC)

    grid = (pl.cdiv(R, tR), pl.cdiv(C, tC))

    out2 = pl.pallas_call(
        _pos_enc_kernel,
        out_shape=jax.ShapeDtypeStruct((R, C), out_dtype),
        grid_spec=pltpu.PrefetchScalarGridSpec(
            num_scalar_prefetch=0,
            grid=grid,
            in_specs=[
                pl.BlockSpec((tR, tC), lambda i, j: (i, j)),   # x tile
                pl.BlockSpec(pe_block, lambda i, j: (0, j)),   # matching pe tile
            ],
            out_specs=pl.BlockSpec((tR, tC), lambda i, j: (i, j)),
        ),
        input_output_aliases={0: 0},   # in-place add on x's buffer
        compiler_params=pltpu.CompilerParams(
            dimension_semantics=("parallel", "parallel"),
            vmem_limit_bytes=vmem_limit,
        ),
    )(x2, pe2)

    return out2.reshape(B, S, D)


if __name__ == "__main__":
    key = jax.random.PRNGKey(0)
    B, S = 2, 5
    x = jax.random.normal(key, (B, S, D_MODEL), dtype=jnp.float32)

    pe = make_pe(D_MODEL, MAX_LEN)

    out = positional_encoding(x, pe)
    out = jax.block_until_ready(out)

    # reference check (plain JAX)
    ref = x + pe[None, :S, :]
    assert out.shape == (B, S, D_MODEL)
    assert jnp.allclose(out, ref, atol=1e-6), "mismatch vs reference"

    print("KERNEL_OK")
</pallas_src>

<mosaic_0001>
module attributes {stable_mosaic.version = 11 : i64} {
  func.func @_pos_enc_kernel(%arg0: i32, %arg1: i32, %arg2: memref<2x20xf32, #tpu.memory_space<vmem>>, %arg3: memref<1x20xf32, #tpu.memory_space<vmem>>, %arg4: memref<2x20xf32, #tpu.memory_space<vmem>>) attributes {dimension_semantics = [#tpu.dimension_semantics<parallel>, #tpu.dimension_semantics<parallel>], iteration_bounds = array<i64: 1, 1>, scalar_prefetch = 0 : i64, scratch_operands = 0 : i64, tpu.core_type = #tpu.core_type<tc>, window_params = [{transform_indices = @transform_0, window_bounds = array<i64: 2, 20>}, {transform_indices = @transform_1, window_bounds = array<i64: 1, 20>}, {transform_indices = @transform_2, window_bounds = array<i64: 2, 20>}]} {
    %c0 = arith.constant 0 : index
    %c0_0 = arith.constant 0 : index
    %0 = vector.load %arg2[%c0, %c0_0] : memref<2x20xf32, #tpu.memory_space<vmem>>, vector<2x20xf32>
    %c0_1 = arith.constant 0 : index
    %c0_2 = arith.constant 0 : index
    %1 = vector.load %arg3[%c0_1, %c0_2] : memref<1x20xf32, #tpu.memory_space<vmem>>, vector<1x20xf32>
    %2 = vector.broadcast %1 : vector<1x20xf32> to vector<2x20xf32>
    %3 = arith.addf %0, %2 : vector<2x20xf32>
    %c0_3 = arith.constant 0 : index
    %c0_4 = arith.constant 0 : index
    %4 = vector.load %arg4[%c0_3, %c0_4] : memref<2x20xf32, #tpu.memory_space<vmem>>, vector<2x20xf32>
    tpu.vector_store %arg4[%c0_3, %c0_4], %3 {strides = array<i32>} : memref<2x20xf32, #tpu.memory_space<vmem>>, vector<2x20xf32>,
    return
  }
  func.func @transform_0(%arg0: i32, %arg1: i32) -> (i32, i32) {
    %c0_i32 = arith.constant 0 : i32
    return %arg0, %arg1 : i32, i32
  }
  func.func @transform_1(%arg0: i32, %arg1: i32) -> (i32, i32) {
    %c0_i32 = arith.constant 0 : i32
    %c0_i32_0 = arith.constant 0 : i32
    return %c0_i32, %arg1 : i32, i32
  }
  func.func @transform_2(%arg0: i32, %arg1: i32) -> (i32, i32) {
    %c0_i32 = arith.constant 0 : i32
    return %arg0, %arg1 : i32, i32
  }
}

</mosaic_0001>

<bundles_post_ra>
// kernel: tpu_custom_call.1
= control target key start
LH: loop header
LB: loop body
LE: loop exit
PB: predicated region body
PF: predicated region fallthrough
CT: control target
= control target key end

     0   :  { %7 = vsyncpa [#allocation3], 0  ;;  %s132_s0 = inlined_call_operand.hbm [shape: f32[2,20], index: 0, kind: input, shape index: {}, may-alias: {0,2}]   ;;  %s133_s1 = inlined_call_operand.vmem [shape: f32[1,20], index: 1, kind: input, shape index: {}]   ;;  %s134_s2 = inlined_call_operand.hbm [shape: f32[2,20], index: 2, kind: output, shape index: {}, may-alias: {0,2}]  }
   0x1   :  { %8 = vsyncpa [#allocation4], 0  ;;  %s14_s11 = sshll.u32 %s132_s0, 4  ;;  %s106_s12 = smov [#allocation2]   ;;  %s15_s11 = int_to_ptr.hbm [resolvable:$true] %s14_s11 }
   0x2   :  { %s16_s13 = sshll.u32 %s106_s12, 4  ;;  %s17_s13 = int_to_ptr.vmem [resolvable:$true] %s16_s13 }
   0x3   :  { %19 = dma.hbm_to_vmem [thread:$0]  %s15_s11, 32, %s17_s13, [#allocation3]  }
   0x4   :  { %102 = dma.done.wait [#allocation3], 32  }
   0x5   :  { %103 = vsyncadd [#allocation3], 4294967264  ;;  %s107_s14 = smov [#allocation5]   ;;  %s41_s18 = sshll.u32 %s134_s2, 4  ;;  %v26_v0 = vld [vmem:[#allocation2] sm:$0x3]  ;;  %s42_s18 = int_to_ptr.hbm [resolvable:$true] %s41_s18 }
   0x6   :  { %s39_s15 = sshll.u32 %s107_s14, 4  ;;  %v53_v1 = vld [vmem:[%s133_s1] ss:$0 sm:$0xff]  ;;  %vm32_vm0 = vcmask 156672   ;;  %s40_s15 = int_to_ptr.vmem [resolvable:$true] %s39_s15 }
   0x7   :  { %v31_v2 = vadd.f32 %v53_v1, %v26_v0 }
   0x9   :  { %33 = vst.msk [vmem:[#allocation5] sm:$0x3] %vm32_vm0, %v31_v2 }
   0xa   :  { %44 = dma.vmem_to_hbm [thread:$0]  %s40_s15, 32, %s42_s18, [#allocation4]  }
   0xb   :  { %104 = dma.done.wait [#allocation4], 32  }
   0xc   :  { %105 = vsyncadd [#allocation4], 4294967264 }
   0xd   :  { %49 = vsyncpa [#allocation3], 1 }
   0xe   :  { %50 = vsyncpa [#allocation4], 1 }

</bundles_post_ra>
